<compile_context>
chip_gen: v6e
topology: v6e:2x2x1
jax: 0.10.0
libtpu: 0.0.40
codegen_flags: <defaults>
</compile_context>

<pallas_src>
import jax
import jax.numpy as jnp
from jax import lax
from jax.experimental import pallas as pl
from jax.experimental.pallas import tpu as pltpu


_T = 1.0          # temperature (the module hard-codes self._t = 1)
_LANES = 128      # lane width
_TM_MAX = 2048    # max rows per block: 2048*128*4B = 1 MiB per f32 input block


def _round_up(x: int, m: int) -> int:
    return (x + m - 1) // m * m


def _sublane_multiple(dtype) -> int:
    """Second-to-last block dim multiple required by the dtype's tiling."""
    return {4: 8, 2: 16, 1: 32}.get(jnp.dtype(dtype).itemsize, 8)


def _num_tensorcores() -> int:
    """Best-effort TensorCore count (2 on v7x, 1 on v5e/v6e). Falls back to 1."""
    try:
        info = pltpu.get_tpu_info()
    except Exception:
        return 1
    for attr in ("num_tensorcores", "tensorcore_count", "num_cores",
                 "cores_per_chip", "core_count"):
        v = getattr(info, attr, None)
        if isinstance(v, int) and 1 <= v <= 8:
            return v
    return 1


def _make_kernel(total: int, tm: int, steps: int, nc: int):
    """Builds the per-(core, step) accumulation kernel."""

    def kernel(p_ref, n_ref, acc_ref):
        if nc > 1:
            c, i = pl.program_id(0), pl.program_id(1)
        else:
            c, i = 0, pl.program_id(0)

        @pl.when(i == 0)
        def _():
            acc_ref[...] = jnp.zeros_like(acc_ref)

        # Logical (unclamped) row offset of this grid step.  Slots past the
        # true element count (tail of the last 128-lane row, garbage rows of a
        # partial block, redundant clamped blocks) are zeroed by this mask.
        row0 = (c * steps + i) * tm
        row_id = lax.broadcasted_iota(jnp.int32, (tm, _LANES), 0)
        lane_id = lax.broadcasted_iota(jnp.int32, (tm, _LANES), 1)
        valid = (row0 + row_id) * _LANES + lane_id < total

        # -log(sigmoid(t*(p-n))) == softplus(t*(n-p)); numerically stable form.
        y = n_ref[...].astype(jnp.float32) - p_ref[...].astype(jnp.float32)
        if _T != 1.0:  # trace-time branch: skip the multiply for t == 1
            y = jnp.float32(_T) * y
        elem = jnp.maximum(y, 0.0) + jnp.log1p(jnp.exp(-jnp.abs(y)))
        elem = jnp.where(valid, elem, 0.0)

        # Fold rows into the vreg-shaped accumulator: tm//8 pure VPU adds.
        acc_ref[...] += jnp.sum(elem.reshape(tm // 8, 8, _LANES), axis=0)[None]

    return kernel


def ranknet_reranker_loss(positives: jax.Array, negatives: jax.Array) -> jax.Array:
    """Pallas implementation of RankNetRerankerLoss.forward (t = 1)."""
    assert positives.shape == negatives.shape, "positives/negatives must match"
    total = int(positives.size)
    assert total > 0
    if negatives.dtype != positives.dtype:
        negatives = negatives.astype(positives.dtype)
    dtype = positives.dtype
    itemsize = jnp.dtype(dtype).itemsize
    sub = _sublane_multiple(dtype)

    rows = pl.cdiv(total, _LANES)

    # Core split only when the chip has >1 TensorCore and enough work exists.
    nc = _num_tensorcores()
    if rows < 2 * nc * sub:
        nc = 1

    # Lane-dense slab: at least one full (sub, 128) tile of rows.  reshape(-1)
    # and the (rows_arr, 128) reshape are free; only a tiny tail pad (values
    # irrelevant — the kernel masks by flat index) is materialized when needed.
    rows_arr = max(rows, sub)
    p = positives.reshape(-1)
    n = negatives.reshape(-1)
    tail = rows_arr * _LANES - total
    if tail:
        p = jnp.pad(p, (0, tail))
        n = jnp.pad(n, (0, tail))
    p = p.reshape(rows_arr, _LANES)
    n = n.reshape(rows_arr, _LANES)

    # Adaptive tile: large, a multiple of the dtype's sublane tile, never
    # larger than the slab (every block is at most a standard trailing
    # partial block, which only DMAs the valid sub-rectangle).
    tm = min(_TM_MAX, _round_up(pl.cdiv(rows_arr, nc), sub))
    tm = min(tm, rows_arr // sub * sub)
    steps = pl.cdiv(rows_arr, nc * tm)          # grid steps per core
    max_block = pl.cdiv(rows_arr, tm) - 1       # last block holding real rows

    if nc > 1:
        grid = (nc, steps)
        in_map = lambda c, i: (jnp.minimum(c * steps + i, max_block), 0)
        out_map = lambda c, i: (c, 0, 0)
        dims = (pltpu.CORE_PARALLEL, pltpu.ARBITRARY)
    else:
        grid = (steps,)
        in_map = lambda i: (jnp.minimum(i, max_block), 0)
        out_map = lambda i: (0, 0, 0)
        dims = (pltpu.ARBITRARY,)

    cost = pl.CostEstimate(
        flops=8 * rows_arr * _LANES,
        transcendentals=2 * rows_arr * _LANES,
        bytes_accessed=2 * rows_arr * _LANES * itemsize + nc * 8 * _LANES * 4,
    )

    partials = pl.pallas_call(
        _make_kernel(total, tm, steps, nc),
        out_shape=jax.ShapeDtypeStruct((nc, 8, _LANES), jnp.float32),
        grid_spec=pltpu.PrefetchScalarGridSpec(
            num_scalar_prefetch=0,
            grid=grid,
            in_specs=[pl.BlockSpec((tm, _LANES), in_map),
                      pl.BlockSpec((tm, _LANES), in_map)],
            out_specs=pl.BlockSpec((1, 8, _LANES), out_map),
        ),
        compiler_params=pltpu.CompilerParams(dimension_semantics=dims),
        cost_estimate=cost,
    )(p, n)

    # Tiny final cross-lane reduce + mean over the TRUE element count.
    return jnp.sum(partials) * jnp.float32(1.0 / total)


def _reference(positives, negatives):
    x = _T * (positives.astype(jnp.float32) - negatives.astype(jnp.float32))
    return jnp.mean(-jnp.log(jax.nn.sigmoid(x)))


if __name__ == "__main__":
    key = jax.random.PRNGKey(0)
    kp, kn, kp2, kn2, kp3, kn3 = jax.random.split(key, 6)

    # Tile-friendly case: 16 "query rows" x 128 candidate pairs (f32).
    p1 = jax.random.normal(kp, (16, 128), dtype=jnp.float32)
    n1 = jax.random.normal(kn, (16, 128), dtype=jnp.float32)
    loss1 = jax.block_until_ready(ranknet_reranker_loss(p1, n1))
    ref1 = _reference(p1, n1)
    assert jnp.allclose(loss1, ref1, rtol=1e-5, atol=1e-5), (loss1, ref1)

    # Ragged case (13*37 pairs): exercises tiny tail pad + flat-index mask.
    p2 = jax.random.normal(kp2, (13, 37), dtype=jnp.float32)
    n2 = jax.random.normal(kn2, (13, 37), dtype=jnp.float32)
    loss2 = jax.block_until_ready(ranknet_reranker_loss(p2, n2))
    ref2 = _reference(p2, n2)
    assert jnp.allclose(loss2, ref2, rtol=1e-5, atol=1e-5), (loss2, ref2)

    # bf16 scores streamed in native dtype (half HBM bytes), partial last block.
    p3 = jax.random.normal(kp3, (32, 100), dtype=jnp.bfloat16)
    n3 = jax.random.normal(kn3, (32, 100), dtype=jnp.bfloat16)
    loss3 = jax.block_until_ready(ranknet_reranker_loss(p3, n3))
    ref3 = _reference(p3, n3)
    assert jnp.allclose(loss3, ref3, rtol=1e-4, atol=1e-4), (loss3, ref3)

    print("KERNEL_OK")
</pallas_src>

<mosaic_0001>
module attributes {stable_mosaic.version = 11 : i64} {
  func.func @kernel(%arg0: i32, %arg1: memref<16x128xf32, #tpu.memory_space<vmem>>, %arg2: memref<16x128xf32, #tpu.memory_space<vmem>>, %arg3: memref<1x8x128xf32, #tpu.memory_space<vmem>>) attributes {dimension_semantics = [#tpu.dimension_semantics<arbitrary>], iteration_bounds = array<i64: 1>, scalar_prefetch = 0 : i64, scratch_operands = 0 : i64, tpu.core_type = #tpu.core_type<tc>, window_params = [{transform_indices = @transform_0, window_bounds = array<i64: 16, 128>}, {transform_indices = @transform_1, window_bounds = array<i64: 16, 128>}, {pipeline_mode = #tpu.pipeline_mode<synchronous>, transform_indices = @transform_2, window_bounds = array<i64: 1, 8, 128>}]} {
    %c0_i32 = arith.constant 0 : i32
    %0 = arith.cmpi eq, %arg0, %c0_i32 : i32
    %1 = arith.extui %0 : i1 to i32
    %c0_i32_0 = arith.constant 0 : i32
    %2 = arith.cmpi ne, %1, %c0_i32_0 : i32
    scf.if %2 {
      %cst_14 = arith.constant 0.000000e+00 : f32
      %33 = vector.broadcast %cst_14 : f32 to vector<1x8x128xf32>
      %c0_15 = arith.constant 0 : index
      %c0_16 = arith.constant 0 : index
      %c0_17 = arith.constant 0 : index
      %34 = vector.load %arg3[%c0_15, %c0_16, %c0_17] : memref<1x8x128xf32, #tpu.memory_space<vmem>>, vector<1x8x128xf32>
      tpu.vector_store %arg3[%c0_15, %c0_16, %c0_17], %33 {strides = array<i32>} : memref<1x8x128xf32, #tpu.memory_space<vmem>>, vector<1x8x128xf32>,
    } else {
    }
    %c0_i32_1 = arith.constant 0 : i32
    %3 = arith.addi %c0_i32_1, %arg0 : i32
    %c16_i32 = arith.constant 16 : i32
    %4 = arith.muli %3, %c16_i32 : i32
    %5 = tpu.iota {dimensions = array<i32: 0>} : vector<16x128xi32>
    %6 = tpu.iota {dimensions = array<i32: 1>} : vector<16x128xi32>
    %7 = vector.broadcast %4 : i32 to vector<16x128xi32>
    %8 = arith.addi %7, %5 : vector<16x128xi32>
    %c128_i32 = arith.constant 128 : i32
    %9 = vector.broadcast %c128_i32 : i32 to vector<16x128xi32>
    %10 = arith.muli %8, %9 : vector<16x128xi32>
    %11 = arith.addi %10, %6 : vector<16x128xi32>
    %c2048_i32 = arith.constant 2048 : i32
    %12 = vector.broadcast %c2048_i32 : i32 to vector<16x128xi32>
    %13 = arith.cmpi slt, %11, %12 : vector<16x128xi32>
    %c0 = arith.constant 0 : index
    %c0_2 = arith.constant 0 : index
    %14 = vector.load %arg2[%c0, %c0_2] : memref<16x128xf32, #tpu.memory_space<vmem>>, vector<16x128xf32>
    %c0_3 = arith.constant 0 : index
    %c0_4 = arith.constant 0 : index
    %15 = vector.load %arg1[%c0_3, %c0_4] : memref<16x128xf32, #tpu.memory_space<vmem>>, vector<16x128xf32>
    %16 = arith.subf %14, %15 : vector<16x128xf32>
    %cst = arith.constant 0.000000e+00 : f32
    %17 = vector.broadcast %cst : f32 to vector<16x128xf32>
    %18 = arith.maximumf %16, %17 : vector<16x128xf32>
    %19 = math.absf %16 : vector<16x128xf32>
    %cst_5 = arith.constant 0.000000e+00 : f32
    %20 = vector.broadcast %cst_5 : f32 to vector<16x128xf32>
    %21 = arith.subf %20, %19 : vector<16x128xf32>
    %22 = math.exp %21 : vector<16x128xf32>
    %23 = math.log1p %22 : vector<16x128xf32>
    %24 = arith.addf %18, %23 : vector<16x128xf32>
    %cst_6 = arith.constant 0.000000e+00 : f32
    %25 = vector.broadcast %cst_6 : f32 to vector<16x128xf32>
    %26 = arith.select %13, %24, %25 : vector<16x128xi1>, vector<16x128xf32>
    %c0_7 = arith.constant 0 : index
    %c0_8 = arith.constant 0 : index
    %c0_9 = arith.constant 0 : index
    %27 = vector.load %arg3[%c0_7, %c0_8, %c0_9] : memref<1x8x128xf32, #tpu.memory_space<vmem>>, vector<1x8x128xf32>
    %28 = vector.shape_cast %26 : vector<16x128xf32> to vector<2x8x128xf32>
    %cst_10 = arith.constant dense<0.000000e+00> : vector<8x128xf32>
    %29 = vector.multi_reduction <add>, %28, %cst_10 [0] : vector<2x8x128xf32> to vector<8x128xf32>
    %30 = vector.shape_cast %29 : vector<8x128xf32> to vector<1x8x128xf32>
    %31 = arith.addf %27, %30 : vector<1x8x128xf32>
    %c0_11 = arith.constant 0 : index
    %c0_12 = arith.constant 0 : index
    %c0_13 = arith.constant 0 : index
    %32 = vector.load %arg3[%c0_11, %c0_12, %c0_13] : memref<1x8x128xf32, #tpu.memory_space<vmem>>, vector<1x8x128xf32>
    tpu.vector_store %arg3[%c0_11, %c0_12, %c0_13], %31 {strides = array<i32>} : memref<1x8x128xf32, #tpu.memory_space<vmem>>, vector<1x8x128xf32>,
    return
  }
  func.func @transform_0(%arg0: i32) -> (i32, i32) {
    %c0_i32 = arith.constant 0 : i32
    %0 = arith.minsi %arg0, %c0_i32 : i32
    %c0_i32_0 = arith.constant 0 : i32
    %c0_i32_1 = arith.constant 0 : i32
    return %0, %c0_i32_0 : i32, i32
  }
  func.func @transform_1(%arg0: i32) -> (i32, i32) {
    %c0_i32 = arith.constant 0 : i32
    %0 = arith.minsi %arg0, %c0_i32 : i32
    %c0_i32_0 = arith.constant 0 : i32
    %c0_i32_1 = arith.constant 0 : i32
    return %0, %c0_i32_0 : i32, i32
  }
  func.func @transform_2(%arg0: i32) -> (i32, i32, i32) {
    %c0_i32 = arith.constant 0 : i32
    %c0_i32_0 = arith.constant 0 : i32
    %c0_i32_1 = arith.constant 0 : i32
    %c0_i32_2 = arith.constant 0 : i32
    return %c0_i32, %c0_i32_0, %c0_i32_1 : i32, i32, i32
  }
}

</mosaic_0001>

<bundles_post_ra>
// kernel: tpu_custom_call.1
= control target key start
LH: loop header
LB: loop body
LE: loop exit
PB: predicated region body
PF: predicated region fallthrough
CT: control target
= control target key end

     0   :  { %7 = vsyncpa [#allocation3], 0  ;;  %s227_s0 = inlined_call_operand.hbm [shape: f32[16,128], index: 0, kind: input, shape index: {}]   ;;  %s228_s1 = inlined_call_operand.hbm [shape: f32[16,128], index: 1, kind: input, shape index: {}]   ;;  %s229_s2 = inlined_call_operand.hbm [shape: f32[1,8,128], index: 2, kind: output, shape index: {}]  }
   0x1   :  { %8 = vsyncpa [#allocation6], 0 }
   0x2   :  { %9 = vsyncpa [#allocation4], 0  ;;  %s198_s9 = smov [#allocation2]  }
   0x3   :  { %s15_s10 = sshll.u32 %s198_s9, 4  ;;  %s16_s10 = int_to_ptr.vmem [resolvable:$true] %s15_s10 }
   0x4   :  { %s140_s11 = scalar_lea.vmem %s16_s10, 256  ;;  %p145_p1 = scmp.lt.s32.totalorder %s16_s10, %s16_s10 }
   0x5   :  { %p141_p0 = scmp.ne.s32.totalorder %s16_s10, %s140_s11  ;;  %p146_p2 = scmp.lt.s32.totalorder %s140_s11, %s140_s11 }
   0x7   :  { %p147_p3 = por %p146_p2, %p145_p1 }
   0x9   :  { %p148_p4 = pnand %p147_p3, %p141_p0 }
   0xb   :  { %151 = shalt.err (!%p148_p4)
}
   0xc   :  { %s199_s12 = smov 128   ;;  %s200_s13 = smov 8  }
   0xd   :  { %21 = dma.hbm_to_vmem [thread:$0]  %s227_s0, 256, %s16_s10, [#allocation3], %s199_s12, %s199_s12, %s200_s13  }
   0xe   :  { %s201_s16 = smov [#allocation5]  }
   0xf   :  { %s27_s17 = sshll.u32 %s201_s16, 4  ;;  %s28_s17 = int_to_ptr.vmem [resolvable:$true] %s27_s17 }
  0x10   :  { %s160_s18 = scalar_lea.vmem %s28_s17, 256  ;;  %p165_p6 = scmp.lt.s32.totalorder %s28_s17, %s28_s17 }
  0x11   :  { %p161_p5 = scmp.ne.s32.totalorder %s28_s17, %s160_s18  ;;  %p166_p7 = scmp.lt.s32.totalorder %s160_s18, %s160_s18 }
  0x13   :  { %p167_p8 = por %p166_p7, %p165_p6 }
  0x15   :  { %p168_p9 = pnand %p167_p8, %p161_p5 }
  0x17   :  { %171 = shalt.err (!%p168_p9)
}
  0x18   :  { %33 = dma.hbm_to_vmem [thread:$0]  %s228_s1, 256, %s28_s17, [#allocation6], %s199_s12, %s199_s12, %s200_s13  }
  0x19   :  { %192 = dma.done.wait [#allocation3], 256  }
  0x1a   :  { %193 = vsyncadd [#allocation3], 4294967040 }
  0x1b   :  { %194 = dma.done.wait [#allocation6], 256  }
  0x1c   :  { %195 = vsyncadd [#allocation6], 4294967040  ;;  %v60_v0 = vld [vmem:[#allocation5] sm:$0xff]  ;;  %v61_v1 = vld [vmem:[#allocation5 + $0x8] sm:$0xff]  ;;  %v46_v13 = vlaneseq  ;;  %s202_s0 = smov [#allocation7]  }
  0x1d   :  { %v62_v2 = vld [vmem:[#allocation2] sm:$0xff]  ;;  %v63_v3 = vld [vmem:[#allocation2 + $0x8] sm:$0xff]  ;;  %s108_s1 = sshll.u32 %s202_s0, 4  ;;  %s109_s1 = int_to_ptr.vmem [resolvable:$true] %s108_s1 }
  0x1e   :  { %v64_v4 = vsub.f32 %v60_v0, %v62_v2  ;;  %v65_v5 = vsub.f32 %v61_v1, %v63_v3  ;;  %v47_v17 = vshrl.u32 %v46_v13, 7  ;;  %v50_v21 = vand.u32 127, %v46_v13  ;;  %s172_s21 = scalar_lea.vmem %s109_s1, 128  ;;  %p177_p11 = scmp.lt.s32.totalorder %s109_s1, %s109_s1 }
  0x1f   :  { %p173_p10 = scmp.ne.s32.totalorder %s109_s1, %s172_s21  ;;  %p178_p12 = scmp.lt.s32.totalorder %s172_s21, %s172_s21 }
  0x20   :  { %v68_v6 = vand.u32 2147483647, %v64_v4  ;;  %v69_v7 = vand.u32 2147483647, %v65_v5  ;;  %v48_v19 = vadd.s32 8, %v47_v17  ;;  %v54_v22 = vmul.u32 128, %v47_v17 }
  0x21   :  { %v66_v32 = vmax.f32 %v64_v4, 0.0  ;;  %v67_v35 = vmax.f32 %v65_v5, 0.0  ;;  %p179_p13 = por %p178_p12, %p177_p11 }
  0x22   :  { %v70_v8 = vsub.f32 0.0, %v68_v6  ;;  %v71_v9 = vsub.f32 0.0, %v69_v7  ;;  %v55_v24 = vmul.u32 128, %v48_v19  ;;  %v56_v28 = vadd.s32 %v54_v22, %v50_v21 }
  0x23   :  { %p180_p0 = pnand %p179_p13, %p173_p10 }
  0x24   :  { %v72_v10 = vmul.f32 1.442695, %v70_v8  ;;  %v74_v11 = vmul.f32 1.442695, %v71_v9  ;;  %v57_v31 = vadd.s32 %v55_v24, %v50_v21  ;;  %vm58_vm2 = vcmp.lt.s32.totalorder %v56_v28, 2048 }
  0x26   :  { %124 = vpow2.f32 %v72_v10  ;;  %vm59_vm3 = vcmp.lt.s32.totalorder %v57_v31, 2048 }
  0x27   :  { %126 = vpow2.f32 %v74_v11 }
  0x33   :  { %v125_v12 = vpop.eup %124 }
  0x34   :  { %v127_v14 = vpop.eup %126  ;;  %v76_v15 = vadd.f32 1.0, %v125_v12  ;;  %v79_v18 = vmul.f32 -0.5, %v125_v12  ;;  %v82_v25 = vand.u32 2147483647, %v125_v12 }
  0x35   :  { %v85_v16 = vadd.f32 1.0, %v127_v14  ;;  %v88_v20 = vmul.f32 -0.5, %v127_v14  ;;  %v91_v27 = vand.u32 2147483647, %v127_v14 }
  0x36   :  { %128 = vlog2.f32 %v76_v15  ;;  %v80_v23 = vadd.f32 1.0, %v79_v18  ;;  %vm83_vm0 = vcmp.lt.f32.partialorder %v82_v25, 0.0004427343 }
  0x37   :  { %130 = vlog2.f32 %v85_v16  ;;  %v89_v26 = vadd.f32 1.0, %v88_v20  ;;  %vm92_vm1 = vcmp.lt.f32.partialorder %v91_v27, 0.0004427343 }
  0x38   :  { %v81_v29 = vmul.f32 %v125_v12, %v80_v23 }
  0x39   :  { %v90_v33 = vmul.f32 %v127_v14, %v89_v26 }
  0x43   :  { %v129_v30 = vpop.eup %128 }
  0x44   :  { %v131_v34 = vpop.eup %130  ;;  %v78_v36 = vmul.f32 0.6931472, %v129_v30 }
  0x45   :  { %v87_v37 = vmul.f32 0.6931472, %v131_v34 }
  0x46   :  { %v84_v38 = vsel %vm83_vm0, %v81_v29, %v78_v36 }
  0x47   :  { %v93_v39 = vsel %vm92_vm1, %v90_v33, %v87_v37  ;;  %v94_v40 = vadd.f32 %v84_v38, %v66_v32 }
  0x48   :  { %v95_v41 = vadd.f32 %v93_v39, %v67_v35 }
  0x49   :  { %v96_v42 = vsel %vm58_vm2, %v94_v40, 0.0 }
  0x4a   :  { %v97_v43 = vsel %vm59_vm3, %v95_v41, 0.0 }
  0x4b   :  { %v99_v44 = vadd.f32 %v97_v43, %v96_v42 }
  0x4d   :  { %101 = vst [vmem:[#allocation7] sm:$0xff] %v99_v44 }
  0x4e   :  { %183 = shalt.err (!%p180_p0)
}
  0x4f   :  { %111 = dma.vmem_to_hbm [thread:$0]  %s109_s1, 128, %s229_s2, [#allocation4]  }
  0x50   :  { %196 = dma.done.wait [#allocation4], 128  }
  0x51   :  { %197 = vsyncadd [#allocation4], 4294967168 }
  0x52   :  { %115 = vsyncpa [#allocation3], 1 }
  0x53   :  { %116 = vsyncpa [#allocation6], 1 }
  0x54   :  { %117 = vsyncpa [#allocation4], 1 }

</bundles_post_ra>
